<compile_context>
chip_gen: v7x
topology: tpu7x:2x2x1
jax: 0.10.0
libtpu: 0.0.40
codegen_flags: <defaults>
</compile_context>

<pallas_src>
import jax
import jax.numpy as jnp
from jax.experimental import pallas as pl
from jax.experimental.pallas import tpu as pltpu


def _round_up(x, m):
    return ((x + m - 1) // m) * m


def _make_patch_embed_kernel(G, n_per_img, TN, Dp):
    """Kernel factory; G, n_per_img, TN, Dp are Python statics (closure)."""

    def kernel(x_ref, w_ref, pos_ref, o_ref):
        # x_ref:   (TN, P)        bf16 patch rows for this grid step (pipelined)
        # w_ref:   (P, Dp)        bf16 projection weight, resident in VMEM
        # pos_ref: (pos_rows, Dp) f32  pos-embedding + bias, resident in VMEM
        # o_ref:   (TN, Dp)       out_dtype
        proj = jnp.dot(x_ref[...], w_ref[...],
                       preferred_element_type=jnp.float32)
        if G == 1:
            # Row-tiled path: take this tile's slice of the resident pos table.
            t = pl.program_id(1)
            start = pl.multiple_of(t * TN, TN)
            o_ref[...] = (proj + pos_ref[pl.ds(start, TN), :]).astype(o_ref.dtype)
        else:
            # Batch-folded path (single row tile per group): broadcast the
            # (n_per_img, Dp) pos table over the G images packed into M.
            # n_per_img is a multiple of 8, so these reshapes are tile-aligned
            # (no data movement).
            out = proj.reshape(G, n_per_img, Dp) + pos_ref[...][None, :, :]
            o_ref[...] = out.reshape(TN, Dp).astype(o_ref.dtype)

    return kernel


def patch_embed(images, weight, bias, pos_embed, patch_size, *,
                target_rows=512, out_dtype=jnp.bfloat16):
    """images: (B, C, H, W) NCHW, weight: (C, ph, pw, D), bias: (D,),
    pos_embed: (N_patches, D). Returns (B, N_patches, D) in `out_dtype`
    (pass jnp.float32 to match the torch module's dtype exactly)."""
    B, C, H, W = images.shape
    ph = pw = patch_size
    h, w = H // ph, W // pw
    N = h * w
    D = weight.shape[-1]
    P = C * ph * pw

    Dp = _round_up(D, 128)     # lane-dense embedding dim
    N_pad = _round_up(N, 8)    # sublane-aligned patch count per image

    # Patch extraction, flattened in (c, ph, pw) order to match EinMix's
    # weight_shape 'c ph pw d'.  Cast to bf16 FIRST so any materialized
    # intermediate of the transpose is 2-byte.
    x = images.astype(jnp.bfloat16)
    x = x.reshape(B, C, h, ph, w, pw)
    x = jnp.transpose(x, (0, 2, 4, 1, 3, 5)).reshape(B, N, P)

    w_flat = weight.reshape(P, D).astype(jnp.bfloat16)
    pos_pb = (pos_embed + bias[None, :]).astype(jnp.float32)  # fold bias into pos

    if Dp != D:
        w_flat = jnp.pad(w_flat, ((0, 0), (0, Dp - D)))
        pos_pb = jnp.pad(pos_pb, ((0, 0), (0, Dp - D)))
    if N_pad != N:
        x = jnp.pad(x, ((0, 0), (0, N_pad - N), (0, 0)))
        pos_pb = jnp.pad(pos_pb, ((0, N_pad - N), (0, 0)))

    if N_pad >= target_rows:
        # Case A: one image per batch group, patch rows tiled along the grid.
        G = 1
        TN = target_rows                      # multiple of 256 (v6e/v7x MXU) and 8
        rows = _round_up(N_pad, TN)
        if rows != N_pad:
            x = jnp.pad(x, ((0, 0), (0, rows - N_pad), (0, 0)))
            pos_pb = jnp.pad(pos_pb, ((0, rows - N_pad), (0, 0)))
        num_groups = B
    else:
        # Case B: fold G whole images into the MXU M dimension.  G divides B
        # exactly (no throwaway padded-batch work); prefer >= 2 batch groups so
        # both TensorCores get work on v7x.
        max_g = max(1, target_rows // N_pad)
        divisors = [g for g in range(1, B + 1) if B % g == 0 and g <= max_g]
        two_step = [g for g in divisors if B // g >= 2]
        G = max(two_step) if two_step else max(divisors)
        TN = G * N_pad                        # multiple of 8 (N_pad is)
        rows = TN
        num_groups = B // G
        x = x.reshape(num_groups, rows, P)
    n_row_tiles = rows // TN

    kernel = _make_patch_embed_kernel(G, N_pad, TN, Dp)

    out = pl.pallas_call(
        kernel,
        out_shape=jax.ShapeDtypeStruct((num_groups, rows, Dp), out_dtype),
        grid_spec=pltpu.PrefetchScalarGridSpec(
            num_scalar_prefetch=0,
            grid=(num_groups, n_row_tiles),
            in_specs=[
                # Patch rows: pipelined per grid step.
                pl.BlockSpec((None, TN, P), lambda g, t: (g, t, 0)),
                # Weight: whole array resident in VMEM (fetched once, single buffer).
                pl.BlockSpec(memory_space=pltpu.MemorySpace.VMEM),
                # Pos+bias: whole array resident in VMEM (fetched once, single buffer).
                pl.BlockSpec(memory_space=pltpu.MemorySpace.VMEM),
            ],
            out_specs=pl.BlockSpec((None, TN, Dp), lambda g, t: (g, t, 0)),
        ),
        compiler_params=pltpu.CompilerParams(
            dimension_semantics=("parallel", "parallel"),
            allow_input_fusion=[True, False, False],
            vmem_limit_bytes=32 * 1024 * 1024,
        ),
    )(x, w_flat, pos_pb)

    # Strip row / lane padding and restore (B, N, D).
    if G == 1:
        out = out[:, :N, :D]
    else:
        out = out.reshape(B, N_pad, Dp)[:, :N, :D]
    return out


def reference(images, weight, bias, pos_embed, patch_size):
    B, C, H, W = images.shape
    ph = pw = patch_size
    h, w = H // ph, W // pw
    x = images.reshape(B, C, h, ph, w, pw)
    x = jnp.transpose(x, (0, 2, 4, 1, 3, 5)).reshape(B, h * w, C * ph * pw)
    return x @ weight.reshape(C * ph * pw, -1) + bias + pos_embed


if __name__ == "__main__":
    # Small, module-consistent shapes: image_size=16, patch_size=4, channels=4,
    # embed_dim=32  ->  N_patches=(16/4)^2=16, patch_dim=4*4*4=64.
    image_size, patch_size, channels, embed_dim = 16, 4, 4, 32
    batch = 2
    n_patches = (image_size // patch_size) ** 2

    key = jax.random.PRNGKey(0)
    k_img, k_w, k_b, k_pos = jax.random.split(key, 4)

    images = jax.random.normal(
        k_img, (batch, channels, image_size, image_size), dtype=jnp.float32)
    weight = jax.random.normal(
        k_w, (channels, patch_size, patch_size, embed_dim), dtype=jnp.float32) * 0.02
    bias = jax.random.normal(k_b, (embed_dim,), dtype=jnp.float32) * 0.02
    pos_embed = jax.random.normal(
        k_pos, (n_patches, embed_dim), dtype=jnp.float32) * 0.01

    out = patch_embed(images, weight, bias, pos_embed, patch_size)
    out = jax.block_until_ready(out)

    ref = reference(images, weight, bias, pos_embed, patch_size)
    assert out.shape == (batch, n_patches, embed_dim)
    assert out.dtype == jnp.bfloat16
    # Loose tolerance accounts for bf16 matmul operands + bf16 output rounding
    # (f32 accumulation on the MXU).
    assert jnp.allclose(out.astype(jnp.float32), ref, atol=3e-2, rtol=3e-2)
    print("KERNEL_OK")
</pallas_src>

<mosaic_0001>
module attributes {stable_mosaic.version = 11 : i64} {
  func.func @kernel(%arg0: i32, %arg1: i32, %arg2: memref<1x16x64xbf16, #tpu.memory_space<vmem>>, %arg3: memref<64x128xbf16, #tpu.memory_space<vmem>>, %arg4: memref<16x128xf32, #tpu.memory_space<vmem>>, %arg5: memref<1x16x128xbf16, #tpu.memory_space<vmem>>) attributes {dimension_semantics = [#tpu.dimension_semantics<parallel>, #tpu.dimension_semantics<parallel>], iteration_bounds = array<i64: 2, 1>, scalar_prefetch = 0 : i64, scratch_operands = 0 : i64, tpu.core_type = #tpu.core_type<tc>, window_params = [{transform_indices = @transform_0, window_bounds = array<i64: 1, 16, 64>}, {pipeline_mode = #tpu.pipeline_mode<synchronous>, transform_indices = @transform_1, window_bounds = array<i64: 64, 128>}, {pipeline_mode = #tpu.pipeline_mode<synchronous>, transform_indices = @transform_2, window_bounds = array<i64: 16, 128>}, {transform_indices = @transform_3, window_bounds = array<i64: 1, 16, 128>}]} {
    %c0 = arith.constant 0 : index
    %c0_0 = arith.constant 0 : index
    %c0_1 = arith.constant 0 : index
    %0 = vector.load %arg2[%c0, %c0_0, %c0_1] : memref<1x16x64xbf16, #tpu.memory_space<vmem>>, vector<1x16x64xbf16>
    %1 = vector.shape_cast %0 : vector<1x16x64xbf16> to vector<16x64xbf16>
    %c0_2 = arith.constant 0 : index
    %c0_3 = arith.constant 0 : index
    %2 = vector.load %arg3[%c0_2, %c0_3] : memref<64x128xbf16, #tpu.memory_space<vmem>>, vector<64x128xbf16>
    %cst = arith.constant dense<0.000000e+00> : vector<16x128xf32>
    %3 = tpu.matmul %1, %2, %cst {dimension_numbers = #tpu.dot_dimension_numbers<[1], [0], [0], [1], [0, 0, 1, 1], [], []>} : vector<16x64xbf16>, vector<64x128xbf16>, vector<16x128xf32> -> vector<16x128xf32>
    %c16_i32 = arith.constant 16 : i32
    %4 = arith.muli %arg1, %c16_i32 : i32
    %5 = tpu.assume_multiple %4, 16 : i32
    %6 = arith.index_cast %5 : i32 to index
    %c0_4 = arith.constant 0 : index
    %7 = vector.load %arg4[%6, %c0_4] : memref<16x128xf32, #tpu.memory_space<vmem>>, vector<16x128xf32>
    %8 = arith.addf %3, %7 : vector<16x128xf32>
    %9 = arith.truncf %8 : vector<16x128xf32> to vector<16x128xbf16>
    %c0_5 = arith.constant 0 : index
    %c0_6 = arith.constant 0 : index
    %c0_7 = arith.constant 0 : index
    %10 = vector.load %arg5[%c0_5, %c0_6, %c0_7] : memref<1x16x128xbf16, #tpu.memory_space<vmem>>, vector<1x16x128xbf16>
    %11 = vector.shape_cast %10 : vector<1x16x128xbf16> to vector<16x128xbf16>
    %12 = vector.shape_cast %9 : vector<16x128xbf16> to vector<1x16x128xbf16>
    tpu.vector_store %arg5[%c0_5, %c0_6, %c0_7], %12 {strides = array<i32>} : memref<1x16x128xbf16, #tpu.memory_space<vmem>>, vector<1x16x128xbf16>,
    return
  }
  func.func @transform_0(%arg0: i32, %arg1: i32) -> (i32, i32, i32) {
    %c0_i32 = arith.constant 0 : i32
    %c0_i32_0 = arith.constant 0 : i32
    return %arg0, %arg1, %c0_i32 : i32, i32, i32
  }
  func.func @transform_1(%arg0: i32, %arg1: i32) -> (i32, i32) {
    %c0_i32 = arith.constant 0 : i32
    %c0_i32_0 = arith.constant 0 : i32
    %c0_i32_1 = arith.constant 0 : i32
    return %c0_i32, %c0_i32_0 : i32, i32
  }
  func.func @transform_2(%arg0: i32, %arg1: i32) -> (i32, i32) {
    %c0_i32 = arith.constant 0 : i32
    %c0_i32_0 = arith.constant 0 : i32
    %c0_i32_1 = arith.constant 0 : i32
    return %c0_i32, %c0_i32_0 : i32, i32
  }
  func.func @transform_3(%arg0: i32, %arg1: i32) -> (i32, i32, i32) {
    %c0_i32 = arith.constant 0 : i32
    %c0_i32_0 = arith.constant 0 : i32
    return %arg0, %arg1, %c0_i32 : i32, i32, i32
  }
}

</mosaic_0001>

<bundles_post_ra>
// kernel: tpu_custom_call.1
= control target key start
LH: loop header
LB: loop body
LE: loop exit
PB: predicated region body
PF: predicated region fallthrough
CT: control target
= control target key end

     0   :  { %8 = vsyncpa [#allocation3], 0  ;;  %s1077_s0 = inlined_call_operand.hbm [shape: bf16[2,16,64], index: 0, kind: input, shape index: {}]   ;;  %s1078_s1 = inlined_call_operand.hbm [shape: bf16[64,128], index: 1, kind: input, shape index: {}]   ;;  %s1079_s2 = inlined_call_operand.hbm [shape: f32[16,128], index: 2, kind: input, shape index: {}]   ;;  %s1080_s3 = inlined_call_operand.hbm [shape: bf16[2,16,128], index: 3, kind: output, shape index: {}]  }
   0x1   :  { %10 = vsyncpa [#allocation3 + $0x1], 0 }
   0x2   :  { %11 = vsyncpa [#allocation6], 0 }
   0x3   :  { %12 = vsyncpa [#allocation4], 0 }
   0x4   :  { %14 = vsyncpa [#allocation4 + $0x1], 0  ;;  %s816_s12 = smov 0   ;;  %s818_s13 = smov 0  }
   0x5   :  { %s820_s14 = smov 0   ;;  %s822_s15 = smov 0  }
   0x6   :  { %s824_s16 = smov 0   ;;  %s826_s17 = smov 0  }
   0x7 LB: > { %s461_s18 = sadd.s32 4294967295, %s782_s17   ;;  %s462_s19 = sadd.s32 4294967294, %s782_s17   ;;  %s782_s17 = sphi %s826_s17, %s20_s17   ;;  %s778_s16 = sphi %s824_s16, %s1102_s16   ;;  %s774_s15 = sphi %s822_s15, %s1101_s15   ;;  %s770_s14 = sphi %s820_s14, %s1100_s14   ;;  %s766_s13 = sphi %s818_s13, %s1099_s13   ;;  %s762_s12 = sphi %s816_s12, %s1098_s12  }
   0x8   : > { %p54_p0 = scmp.ne.s32.totalorder %s766_s13, %s762_s12  ;;  %p850_p1 = scmp.eq.s32.totalorder %s461_s18, 0 }
   0x9   : > { %p854_p2 = scmp.eq.s32.totalorder %s461_s18, 1  ;;  %p128_p3 = scmp.eq.s32.totalorder %s462_s19, 1 }
   0xa   : > { %s1085_s20 = scalar_select %p850_p1, 1, 0 }
   0xb   : > { %p860_p4 = por %p850_p1, %p54_p0  ;;  %p463_p5 = scmp.ge.s32.totalorder %s782_s17, 1 }
   0xc   : > { %p865_p6 = por %p128_p3, %p54_p0  ;;  %p135_p7 = scmp.lt.s32.totalorder %s782_s17, 3 }
   0xd   : > { %s1087_s22 = scalar_select %p860_p4, 1, 0 }
   0xe   : > { %s1088_s23 = scalar_select %p865_p6, 1, 0 }
   0xf   : > { %p870_p8 = pnand %p463_p5, %p135_p7  ;;  %s784_s25 = smov [#allocation5]  }
  0x10   : > { %s147_s26 = sshll.u32 %s784_s25, 4  ;;  %s785_s28 = smov [#allocation7]   ;;  %s874_s26 = int_to_ptr.vmem [resolvable:$true] %s147_s26 }
  0x11   : > { %p526_p9 = pneg %p870_p8  ;;  %s160_s29 = sshll.u32 %s785_s28, 4  ;;  %s885_s29 = int_to_ptr.vmem [resolvable:$true] %s160_s29 }
  0x12   : > { %s610_s5 = scalar_lea.hbm %s1078_s1, 512 }
  0x13   : > { %p881_p11 = pnand %p526_p9, %p850_p1  ;;  %p611_p12 = scmp.ne.s32.totalorder %s1078_s1, %s610_s5 }
  0x14   : > { %p617_p5 = scmp.lt.u32.totalorder %s610_s5, %s1078_s1 }
  0x15   : > { %p612_p13 = pneg %p881_p11 }
  0x17   : > { %p613_p0 = pnand %p612_p13, %p611_p12 }
  0x19   : > { %p614_p3 = pneg %p613_p0 }
  0x1b   : > { %p619_p7 = pnand %p617_p5, %p614_p3 }
  0x1d   : > { %622 = shalt.err (!%p619_p7)
}
  0x1e   : > { %s623_s10 = scalar_lea.vmem %s874_s26, 512  ;;  %p631_p1 = scmp.lt.s32.totalorder %s874_s26, %s874_s26 }
  0x1f   : > { %p624_p9 = scmp.ne.s32.totalorder %s874_s26, %s623_s10  ;;  %p632_p12 = scmp.lt.s32.totalorder %s623_s10, %s623_s10 }
  0x21   : > { %p626_p10 = pnand %p624_p9, %p612_p13  ;;  %p633_p0 = por %p632_p12, %p631_p1 }
  0x23   : > { %p627_p6 = pneg %p626_p10 }
  0x25   : > { %p634_p4 = pnand %p633_p0, %p627_p6 }
  0x27   : > { %637 = shalt.err (!%p634_p4)
}
  0x28   : > { %s786_s11 = smov 64   ;;  %s787_s18 = smov 4  }
  0x29   : > { %529 = dma.hbm_to_vmem [thread:$0]  (!%p881_p11), %s1078_s1, 512, %s874_s26, [#allocation6], %s786_s11, %s786_s11, %s787_s18  }
  0x2a   : > { %s638_s4 = scalar_lea.hbm %s1079_s2, 256 }
  0x2b   : > { %p639_p1 = scmp.ne.s32.totalorder %s1079_s2, %s638_s4  ;;  %p645_p10 = scmp.lt.u32.totalorder %s638_s4, %s1079_s2 }
  0x2d   : > { %p641_p4 = pnand %p639_p1, %p612_p13 }
  0x2f   : > { %p642_p6 = pneg %p641_p4 }
  0x31   : > { %p647_p3 = pnand %p645_p10, %p642_p6 }
  0x33   : > { %650 = shalt.err (!%p647_p3)
}
  0x34   : > { %s651_s26 = scalar_lea.vmem %s885_s29, 256  ;;  %p659_p12 = scmp.lt.s32.totalorder %s885_s29, %s885_s29 }
  0x35   : > { %p652_p5 = scmp.ne.s32.totalorder %s885_s29, %s651_s26  ;;  %p660_p0 = scmp.lt.s32.totalorder %s651_s26, %s651_s26 }
  0x37   : > { %p654_p7 = pnand %p652_p5, %p612_p13  ;;  %p661_p1 = por %p660_p0, %p659_p12 }
  0x39   : > { %p655_p9 = pneg %p654_p7 }
  0x3b   : > { %p662_p4 = pnand %p661_p1, %p655_p9 }
  0x3d   : > { %665 = shalt.err (!%p662_p4)
}
  0x3e   : > { %s788_s9 = smov 128   ;;  %s789_s10 = smov 8  }
  0x3f   : > { %532 = dma.hbm_to_vmem [thread:$0]  (!%p881_p11), %s1079_s2, 256, %s885_s29, [#allocation6], %s788_s9, %s788_s9, %s789_s10  }
  0x40   : > { %s32_s28 = sadd.s32 1, %s778_s16  ;;  %s41_s30 = sadd.s32 1, %s770_s14 }
  0x41   : > { %p34_p13 = scmp.ge.s32.totalorder %s32_s28, 2  ;;  %p48_p6 = scmp.ne.s32.totalorder %s770_s14, %s766_s13 }
  0x42   : > { %p49_p10 = scmp.eq.s32.totalorder %s782_s17, 0  ;;  %p543_p3 = scmp.lt.s32.totalorder %s782_s17, 2 }
  0x43   : > { %s1104_s28 = smov (%p34_p13, %s32_s28), 0  ;;  %p952_p7 = por %p854_p2, %p48_p6 }
  0x44   : > { %p50_p5 = por %p49_p10, %p48_p6  ;;  %s36_s27 = ssub.s32 %s778_s16, %s1104_s28 }
  0x45   : > { %s1091_s4 = scalar_select %p952_p7, 1, 0 }
  0x46   : > { %s174_s5 = sand.u32 1, %s770_s14   ;;  %p39_p9 = scmp.eq.s32.totalorder %s36_s27, 0 }
  0x47   : > { %s467_s29 = sshll.u32 %s174_s5, 3  ;;  %s488_s6 = sshll.u32 %s778_s16, 7 }
  0x48   : > { %s961_s7 = scalar_select %p39_p9, %s770_s14, %s41_s30  }
  0x49   : > { %s966_s9 = scalar_lea.hbm %s1077_s0, %s488_s6  ;;  %s178_s21 = scalar_lea.vmem [#allocation2], %s467_s29 }
  0x4a   : > { %s187_s10 = sshll.u32 %s178_s21, 4  ;;  %p970_p2 = pnand %p543_p3, %p50_p5  ;;  %s974_s10 = int_to_ptr.vmem [resolvable:$true] %s187_s10 }
  0x4b   : > { %s976_s25 = scalar_lea.sflag [#allocation3], %s174_s5  ;;  %s666_s30 = scalar_lea.hbm %s966_s9, 128 }
  0x4c   : > { %p667_p11 = scmp.ne.s32.totalorder %s966_s9, %s666_s30  ;;  %p668_p12 = pneg %p970_p2 }
  0x4d   : > { %s671_s6 = scalar_lea.hbm %s1077_s0, 256  ;;  %p672_p4 = scmp.lt.u32.totalorder %s966_s9, %s1077_s0 }
  0x4e   : > { %p669_p0 = pnand %p668_p12, %p667_p11  ;;  %p673_p13 = scmp.lt.u32.totalorder %s671_s6, %s666_s30 }
  0x4f   : > { %p675_p10 = scmp.lt.u32.totalorder %s666_s30, %s966_s9 }
  0x50   : > { %p670_p1 = pneg %p669_p0  ;;  %p674_p6 = por %p673_p13, %p672_p4 }
  0x52   : > { %p676_p3 = por %p675_p10, %p674_p6 }
  0x54   : > { %p677_p5 = pnand %p676_p3, %p670_p1 }
  0x56   : > { %680 = shalt.err (!%p677_p5)
}
  0x57   : > { %s681_s5 = scalar_lea.vmem %s974_s10, 128  ;;  %s790_s21 = smov [#allocation2]  }
  0x58   : > { %p682_p9 = scmp.ne.s32.totalorder %s974_s10, %s681_s5  ;;  %s686_s27 = sshll.u32 %s790_s21, 4  ;;  %s687_s27 = int_to_ptr.vmem [resolvable:$false] %s686_s27 }
  0x59   : > { %s688_s29 = scalar_lea.vmem %s687_s27, 256  ;;  %p689_p7 = scmp.lt.s32.totalorder %s974_s10, %s687_s27 }
  0x5a   : > { %p684_p11 = pnand %p682_p9, %p668_p12  ;;  %p690_p4 = scmp.lt.s32.totalorder %s688_s29, %s681_s5 }
  0x5c   : > { %p685_p0 = pneg %p684_p11  ;;  %p691_p13 = por %p690_p4, %p689_p7 }
  0x5e   : > { %p692_p6 = pnand %p691_p13, %p685_p0 }
  0x60   : > { %695 = shalt.err (!%p692_p6)
}
  0x61   : > { %536 = dma.hbm_to_vmem [thread:$0]  (!%p970_p2), %s966_s9, 128, %s974_s10, %s976_s25, %s786_s11, %s786_s11, %s787_s18  }
  0x62   : > { %199 = sbr.rel (%p870_p8) target bundleno = 359 (0x167), region = 32  ;;  %s1010_s30 = sand.u32 (!%p870_p8), 1, %s766_s13  }
  0x63   : > { %s471_s6 = sshll.u32 (!%p870_p8), %s1010_s30, 3  ;;  %s202_s8 = scalar_lea.sflag (!%p870_p8), [#allocation3], %s1010_s30 }
  0x64   : > { %s205_s26 = scalar_lea.vmem (!%p870_p8), [#allocation2], %s471_s6  ;;  %p1093_p7 = scmp.ne.s32.totalorder (!%p870_p8), %s1087_s22, 0 }
  0x69   : > { %749 = dma.done.wait (%p1093_p7), %s202_s8, 128  }
  0x6a   : > { %751 = vsyncadd (%p1093_p7), %s202_s8, 4294967168  ;;  %p1094_p12 = scmp.ne.s32.totalorder %s1085_s20, 0 }
  0x6c   : > { %753 = dma.done.wait (%p1094_p12), [#allocation6], 768  }
  0x6d   : > { %755 = vsyncadd (%p1094_p12), [#allocation6], 4294966528  ;;  %v791_v0 = vmov 0.0   ;;  %vm792_vm0 = vmmov 0   ;;  %v605_v1 = vld [vmem:[#allocation5] sm:$0xff]   ;;  %v606_v2 = vld [vmem:[#allocation5 + $0x8] sm:$0xff]  }
  0x6e   : > { %502 = vmatprep.subr.bf16.mxu0 %v791_v0  ;;  %510 = vmatprep.mubr.msk.bf16.mxu0 %vm792_vm0, %v791_v0  ;;  %v607_v3 = vld [vmem:[#allocation5 + $0x10] sm:$0xff]   ;;  %v608_v4 = vld [vmem:[#allocation5 + $0x18] sm:$0xff]   ;;  %vm282_vm1 = vcmask 523264   ;;  %v251_v6 = vld [vmem:[#allocation7] sm:$0xff]  ;;  %s235_s20 = scalar_lea.vmem [#allocation8], %s471_s6  ;;  %s491_s24 = sshll.u32 %s774_s15, 7 }
  0x6f   : > { %503 = vmatpush3.bf16.msra.mxu0 %v605_v1  ;;  %v609_v5 = vld [vmem:[%s205_s26] sm:$0xff]   ;;  %v252_v8 = vld [vmem:[#allocation7 + $0x8] sm:$0xff]  ;;  %s353_s22 = sshll.u32 %s235_s20, 4  ;;  %s1028_s9 = scalar_lea.hbm %s1080_s3, %s491_s24  ;;  %s1023_s22 = int_to_ptr.vmem [resolvable:$true] %s353_s22 }
  0x70   : > { %504 = vmatprep.subr.bf16.mxu0 %v791_v0  ;;  %s338_s10 = scalar_lea.sflag [#allocation4], %s1010_s30  ;;  %s696_s19 = scalar_lea.vmem %s1023_s22, 128 }
  0x71   : > { %p697_p8 = scmp.ne.s32.totalorder %s1023_s22, %s696_s19  ;;  %p1095_p2 = scmp.ne.s32.totalorder %s1091_s4, 0 }
  0x72   : > { %s793_s15 = smov [#allocation8]  }
  0x73   : > { %505 = vmatpush3.bf16.msra.mxu0 %v606_v2  ;;  %p698_p1 = pnand %p697_p8, %p1095_p2  ;;  %s700_s25 = sshll.u32 %s793_s15, 4  ;;  %s701_s25 = int_to_ptr.vmem [resolvable:$false] %s700_s25 }
  0x74   : > { %506 = vmatprep.subr.bf16.mxu0 %v791_v0  ;;  %s702_s5 = scalar_lea.vmem %s701_s25, 256  ;;  %p703_p3 = scmp.lt.s32.totalorder %s1023_s22, %s701_s25 }
  0x75   : > { %p699_p10 = pneg %p698_p1  ;;  %p704_p5 = scmp.lt.s32.totalorder %s702_s5, %s696_s19 }
  0x77   : > { %507 = vmatpush3.bf16.msra.mxu0 %v607_v3  ;;  %p705_p9 = por %p704_p5, %p703_p3 }
  0x78   : > { %508 = vmatprep.subr.bf16.mxu0 %v791_v0 }
  0x79   : > { %p706_p11 = pnand %p705_p9, %p699_p10 }
  0x7b   : > { %509 = vmatpush3.bf16.msra.mxu0 %v608_v4 }
  0x7e   : > { %511 = vmatmul.mubr.msk.bf16.vlgmr.msra.gmra.mrb[0].mxu0 %vm282_vm1, %v609_v5 }
 0x151   : > { %v320_v7 = vpop.f32.mrb[0].mxu0 }
 0x152   : > { %v512_v9 = vpop.f32.mrb[1].mxu0  ;;  %v321_v11 = vadd.f32 %v320_v7, %v251_v6 }
 0x153   : > { %v323_v10 = vpop.f32.mrb[2].mxu0 }
 0x154   : > { %v324_v12 = vadd.f32 %v323_v10, %v252_v8  ;;  %v513_v13 = vpop.f32.mrb[3].mxu0 }
 0x156   : > { %v495_v14 = vpack.c.bf16 %v324_v12, %v321_v11 }
 0x158   : > { %496 = vst [vmem:[%s235_s20] sm:$0xff] %v495_v14  }
 0x159   : > { %709 = shalt.err (!%p706_p11)
}
 0x15a   : > { %s710_s21 = scalar_lea.hbm %s1028_s9, 128  ;;  %s714_s6 = scalar_lea.hbm %s1080_s3, 256 }
 0x15b   : > { %p711_p0 = scmp.ne.s32.totalorder %s1028_s9, %s710_s21  ;;  %p715_p6 = scmp.lt.u32.totalorder %s1028_s9, %s1080_s3 }
 0x15c   : > { %p716_p7 = scmp.lt.u32.totalorder %s714_s6, %s710_s21  ;;  %p718_p8 = scmp.lt.u32.totalorder %s710_s21, %s1028_s9 }
 0x15d   : > { %p712_p4 = pnand %p711_p0, %p1095_p2 }
 0x15e   : > { %p717_p12 = por %p716_p7, %p715_p6 }
 0x15f   : > { %p713_p13 = pneg %p712_p4 }
 0x160   : > { %p719_p1 = por %p718_p8, %p717_p12 }
 0x162   : > { %p720_p10 = pnand %p719_p1, %p713_p13 }
 0x164   : > { %723 = shalt.err (!%p720_p10)
}
 0x165   : > { %s794_s20 = smov 64   ;;  %s795_s24 = smov 4  }
 0x166   : > { %524 = dma.vmem_to_hbm [thread:$0]  (%p1095_p2), %s1023_s22, 128, %s1028_s9, %s338_s10, %s794_s20, %s794_s20, %s795_s24  }
 0x167 PF: > { %s368_s11 = sand.u32 1, %s762_s12   ;;  %p1096_p3 = scmp.ne.s32.totalorder %s1088_s23, 0 }
 0x168   : > { %p1097_p5 = scmp.ge.s32.totalorder %s782_s17, 2  ;;  %s369_s18 = scalar_lea.sflag [#allocation4], %s368_s11 }
 0x16a   : > { %p538_p9 = pnand %p1097_p5, %p1096_p3 }
 0x16c   : > { %757 = dma.done.wait (!%p538_p9), %s369_s18, 128  }
 0x16d   : > { %759 = vsyncadd (!%p538_p9), %s369_s18, 4294967168  ;;  %s20_s17 = sadd.s32 1, %s782_s17   ;;  %s1098_s12 = smov %s766_s13 }
 0x16e   : > { %p17_p11 = scmp.ge.s32.totalorder %s20_s17, 4   ;;  %s1099_s13 = smov %s770_s14 }
 0x16f   : > { %s1100_s14 = smov %s961_s7  ;;  %s1101_s15 = smov %s778_s16 }
 0x170   : > { %s1102_s16 = smov %s1104_s28  ;;  %19 = sbr.rel (!%p17_p11) target bundleno = 7 (0x7), region = 86 }
 0x177   :  { %374 = vsyncpa [#allocation3], 1 }
 0x178   :  { %376 = vsyncpa [#allocation3 + $0x1], 1 }
 0x179   :  { %377 = vsyncpa [#allocation6], 1 }
 0x17a   :  { %378 = vsyncpa [#allocation4], 1 }
 0x17b   :  { %380 = vsyncpa [#allocation4 + $0x1], 1 }

</bundles_post_ra>
